<compile_context>
chip_gen: v7x
topology: tpu7x:2x2x1
jax: 0.10.0
libtpu: 0.0.40
codegen_flags: <defaults>
</compile_context>

<pallas_src>
import functools
import math

import jax
import jax.numpy as jnp
from jax import lax
from jax.experimental import pallas as pl
from jax.experimental.pallas import tpu as pltpu


# ----------------------------------------------------------------------------
# Helpers
# ----------------------------------------------------------------------------
def _pick_tile(dim, cap, align, prefer=None):
    """Largest divisor of `dim` that is <= cap and a multiple of `align`.

    Prefers multiples of `prefer` (e.g. 256 = v6e/v7x MXU width). If no aligned
    divisor exists, returns the FULL dim (always a legal unmasked block) rather
    than an unaligned divisor.
    """
    if dim <= cap:
        return dim
    best = None
    for t in range(cap, 0, -1):
        if dim % t != 0 or t % align != 0:
            continue
        if prefer is not None and t % prefer == 0:
            return t
        if best is None:
            best = t
    if best is not None:
        return best
    # TODO(synk): pad the array in the wrapper instead of taking the full dim.
    return dim


@functools.lru_cache(maxsize=1)
def _vmem_limit_bytes():
    """Per-generation scoped-VMEM budget: ~3/4 of physical, min 32 MiB."""
    cap = None
    try:
        info = pltpu.get_tpu_info()
        cap = getattr(info, "vmem_capacity_bytes", None)
    except Exception:
        cap = None
    if not cap:
        return 48 * 1024 * 1024          # conservative: safe on v5e/v6e/v7x
    return max(32 * 1024 * 1024, (int(cap) * 3) // 4)


def _sublane_align(dtype):
    return 16 if dtype == jnp.bfloat16 else 8


# ----------------------------------------------------------------------------
# Kernel 1/3: tiled matmul  y = x @ W + b  [+ residual -> LayerNorm]
#   grid = (M//tm, N//tn, K//tk); f32 VMEM accumulator; bias / residual+LN
#   applied once on the last K step (pl.when flush).
# ----------------------------------------------------------------------------
def _matmul_kernel(x_ref, w_ref, b_ref, *rest, fuse_res_ln, ln_eps):
    if fuse_res_ln:
        res_ref, g_ref, beta_ref, o_ref, acc_ref = rest
    else:
        o_ref, acc_ref = rest

    k = pl.program_id(2)

    @pl.when(k == 0)
    def _init():
        acc_ref[...] = jnp.zeros_like(acc_ref)

    acc_ref[...] += jnp.dot(x_ref[...], w_ref[...],
                            preferred_element_type=jnp.float32)

    @pl.when(k == pl.num_programs(2) - 1)
    def _flush():
        y = acc_ref[...] + b_ref[...].astype(jnp.float32)
        if fuse_res_ln:
            # residual add + LayerNorm in f32, fused into the epilogue (tn == N)
            y = y + res_ref[...].astype(jnp.float32)
            mean = jnp.mean(y, axis=-1, keepdims=True)
            c = y - mean
            var = jnp.mean(c * c, axis=-1, keepdims=True)
            y = c * lax.rsqrt(var + ln_eps)
            y = y * g_ref[...].astype(jnp.float32) + beta_ref[...].astype(jnp.float32)
        o_ref[...] = y.astype(o_ref.dtype)


def fused_linear(x2d, w, b, *, residual=None, ln_gamma=None, ln_beta=None,
                 ln_eps=1e-5, compute_dtype=jnp.bfloat16, out_dtype=None,
                 tm_cap=256, tn_cap=512, tk_cap=512):
    """x2d: (M, K), w: (K, N), b: (N,) -> (M, N).  Optional residual+LayerNorm epilogue."""
    M, K = x2d.shape
    Kw, N = w.shape
    assert K == Kw
    fuse_res_ln = ln_gamma is not None
    if fuse_res_ln:
        assert residual is not None and ln_beta is not None
        tm_cap = min(tm_cap, 128)        # tn is forced to N: keep acc/out/res small (v7x VMEM)
    out_dtype = out_dtype or x2d.dtype

    sub = _sublane_align(compute_dtype)
    tm = _pick_tile(M, tm_cap, 8, prefer=sub)
    tk = _pick_tile(K, tk_cap, 128, prefer=256)
    tn = N if fuse_res_ln else _pick_tile(N, tn_cap, 128, prefer=256)
    grid = (M // tm, N // tn, K // tk)

    # bf16 MXU operands (accumulation stays f32 inside the kernel)
    xc = x2d.astype(compute_dtype)
    wc = w.astype(compute_dtype)
    b2d = b.reshape(1, N)

    in_specs = [
        pl.BlockSpec((tm, tk), lambda i, j, k: (i, k)),
        pl.BlockSpec((tk, tn), lambda i, j, k: (k, j)),
        pl.BlockSpec((1, tn), lambda i, j, k: (0, j)),
    ]
    args = [xc, wc, b2d]
    if fuse_res_ln:
        in_specs += [
            pl.BlockSpec((tm, tn), lambda i, j, k: (i, j)),
            pl.BlockSpec((1, tn), lambda i, j, k: (0, j)),
            pl.BlockSpec((1, tn), lambda i, j, k: (0, j)),
        ]
        args += [residual, ln_gamma.reshape(1, N), ln_beta.reshape(1, N)]

    kern = functools.partial(_matmul_kernel, fuse_res_ln=fuse_res_ln, ln_eps=ln_eps)

    return pl.pallas_call(
        kern,
        out_shape=jax.ShapeDtypeStruct((M, N), out_dtype),
        grid_spec=pltpu.PrefetchScalarGridSpec(
            num_scalar_prefetch=0,
            grid=grid,
            in_specs=in_specs,
            out_specs=pl.BlockSpec((tm, tn), lambda i, j, k: (i, j)),
            scratch_shapes=[pltpu.VMEM((tm, tn), jnp.float32)],
        ),
        compiler_params=pltpu.CompilerParams(
            dimension_semantics=("parallel", "parallel", "arbitrary"),
            vmem_limit_bytes=_vmem_limit_bytes(),
        ),
    )(*args)


# ----------------------------------------------------------------------------
# Kernel 2: multi-head attention, flash-style.
#   grid = (B, H, S // tkv). Head split is done by the BlockSpec DMA on
#   head-major (B, H, S, d_k) inputs; online softmax over KV tiles so the
#   full (S, S) score matrix never exists. 1/sqrt(d_k) is pre-folded into W_q.
# ----------------------------------------------------------------------------
def _mha_kernel(q_ref, k_ref, v_ref, o_ref, m_sc, l_sc, acc_sc, *, compute_dtype):
    kv = pl.program_id(2)

    @pl.when(kv == 0)
    def _init():
        m_sc[...] = jnp.full_like(m_sc, -jnp.inf)
        l_sc[...] = jnp.zeros_like(l_sc)
        acc_sc[...] = jnp.zeros_like(acc_sc)

    q = q_ref[0, 0].astype(compute_dtype)        # (S, d_k)  (already scaled)
    k = k_ref[0, 0].astype(compute_dtype)        # (tkv, d_k)
    v = v_ref[0, 0].astype(compute_dtype)        # (tkv, d_k)

    # TODO(synk): attention-mask path (masked_fill -1e9) not wired; mask=None only.
    # scores = q @ k^T (contract last dims of both; no explicit transpose)
    s = lax.dot_general(q, k, (((1,), (1,)), ((), ())),
                        preferred_element_type=jnp.float32)      # (S, tkv)

    m_prev = m_sc[...]
    m_new = jnp.maximum(m_prev, jnp.max(s, axis=-1, keepdims=True))
    alpha = jnp.exp(m_prev - m_new)
    p = jnp.exp(s - m_new)
    l_sc[...] = alpha * l_sc[...] + jnp.sum(p, axis=-1, keepdims=True)
    acc_sc[...] = alpha * acc_sc[...] + jnp.dot(p.astype(compute_dtype), v,
                                                preferred_element_type=jnp.float32)
    m_sc[...] = m_new

    @pl.when(kv == pl.num_programs(2) - 1)
    def _flush():
        # exact reciprocal: epilogue, off the hot matmul path -> reference parity
        o_ref[0, 0] = (acc_sc[...] / l_sc[...]).astype(o_ref.dtype)


def pallas_mha(q, k, v, *, compute_dtype=jnp.bfloat16, out_dtype=None, tkv_cap=512):
    """q, k, v: (B, H, S, d_k) head-major.  Returns (B, H, S, d_k)."""
    B, H, S, d_k = q.shape
    out_dtype = out_dtype or q.dtype
    tkv = _pick_tile(S, tkv_cap, 8, prefer=_sublane_align(compute_dtype))
    # TODO(synk): also tile the query dim for very long S (q resident per (b,h) today).

    kern = functools.partial(_mha_kernel, compute_dtype=compute_dtype)
    return pl.pallas_call(
        kern,
        out_shape=jax.ShapeDtypeStruct((B, H, S, d_k), out_dtype),
        grid_spec=pltpu.PrefetchScalarGridSpec(
            num_scalar_prefetch=0,
            grid=(B, H, S // tkv),
            in_specs=[
                pl.BlockSpec((1, 1, S, d_k), lambda b, h, kv: (b, h, 0, 0)),
                pl.BlockSpec((1, 1, tkv, d_k), lambda b, h, kv: (b, h, kv, 0)),
                pl.BlockSpec((1, 1, tkv, d_k), lambda b, h, kv: (b, h, kv, 0)),
            ],
            out_specs=pl.BlockSpec((1, 1, S, d_k), lambda b, h, kv: (b, h, 0, 0)),
            scratch_shapes=[
                pltpu.VMEM((S, 1), jnp.float32),     # running max
                pltpu.VMEM((S, 1), jnp.float32),     # running denom
                pltpu.VMEM((S, d_k), jnp.float32),   # running PV accumulator
            ],
        ),
        compiler_params=pltpu.CompilerParams(
            dimension_semantics=("parallel", "parallel", "arbitrary"),
            vmem_limit_bytes=_vmem_limit_bytes(),
        ),
    )(q, k, v)


# ----------------------------------------------------------------------------
# Kernel 4: fused FFN  out = LayerNorm(x + relu(x@W1 + b1)@W2 + b2)
#   grid = (M//tm, d_ff//tff): the (tm, tff) hidden tile stays in VMEM/vregs,
#   the (M, d_ff) hidden activation never round-trips HBM. Residual is x itself.
# ----------------------------------------------------------------------------
def _ffn_kernel(x_ref, w1_ref, b1_ref, w2_ref, b2_ref, g_ref, beta_ref,
                o_ref, acc_ref, *, ln_eps, compute_dtype):
    f = pl.program_id(1)

    @pl.when(f == 0)
    def _init():
        acc_ref[...] = jnp.zeros_like(acc_ref)

    x = x_ref[...]
    h = jnp.dot(x.astype(compute_dtype), w1_ref[...],
                preferred_element_type=jnp.float32)                    # (tm, tff)
    h = jnp.maximum(h + b1_ref[...].astype(jnp.float32), 0.0)
    acc_ref[...] += jnp.dot(h.astype(compute_dtype), w2_ref[...],
                            preferred_element_type=jnp.float32)        # (tm, D)

    @pl.when(f == pl.num_programs(1) - 1)
    def _flush():
        y = acc_ref[...] + b2_ref[...].astype(jnp.float32) + x.astype(jnp.float32)
        mean = jnp.mean(y, axis=-1, keepdims=True)
        c = y - mean
        var = jnp.mean(c * c, axis=-1, keepdims=True)
        y = c * lax.rsqrt(var + ln_eps)
        y = y * g_ref[...].astype(jnp.float32) + beta_ref[...].astype(jnp.float32)
        o_ref[...] = y.astype(o_ref.dtype)


def fused_ffn(x2d, w1, b1, w2, b2, gamma, beta, *, ln_eps=1e-5,
              compute_dtype=jnp.bfloat16, out_dtype=None,
              tm_cap=128, tff_cap=512):
    M, D = x2d.shape
    Dw, d_ff = w1.shape
    assert D == Dw and w2.shape == (d_ff, D)
    out_dtype = out_dtype or x2d.dtype

    tm = _pick_tile(M, tm_cap, 8, prefer=_sublane_align(compute_dtype))
    tff = _pick_tile(d_ff, tff_cap, 128, prefer=256)
    grid = (M // tm, d_ff // tff)

    w1c = w1.astype(compute_dtype)
    w2c = w2.astype(compute_dtype)

    kern = functools.partial(_ffn_kernel, ln_eps=ln_eps, compute_dtype=compute_dtype)
    return pl.pallas_call(
        kern,
        out_shape=jax.ShapeDtypeStruct((M, D), out_dtype),
        grid_spec=pltpu.PrefetchScalarGridSpec(
            num_scalar_prefetch=0,
            grid=grid,
            in_specs=[
                pl.BlockSpec((tm, D), lambda i, f: (i, 0)),        # x (also residual)
                pl.BlockSpec((D, tff), lambda i, f: (0, f)),       # W1 tile
                pl.BlockSpec((1, tff), lambda i, f: (0, f)),       # b1 tile
                pl.BlockSpec((tff, D), lambda i, f: (f, 0)),       # W2 tile
                pl.BlockSpec((1, D), lambda i, f: (0, 0)),         # b2
                pl.BlockSpec((1, D), lambda i, f: (0, 0)),         # gamma2
                pl.BlockSpec((1, D), lambda i, f: (0, 0)),         # beta2
            ],
            out_specs=pl.BlockSpec((tm, D), lambda i, f: (i, 0)),
            scratch_shapes=[pltpu.VMEM((tm, D), jnp.float32)],
        ),
        compiler_params=pltpu.CompilerParams(
            dimension_semantics=("parallel", "arbitrary"),
            vmem_limit_bytes=_vmem_limit_bytes(),
        ),
    )(x2d, w1c, b1.reshape(1, d_ff), w2c, b2.reshape(1, D),
      gamma.reshape(1, D), beta.reshape(1, D))


# ----------------------------------------------------------------------------
# EncoderLayer wrapper (reshapes/transposes only; every matmul / softmax / LN in Pallas)
# ----------------------------------------------------------------------------
class EncoderLayerPallas:
    def __init__(self, d_model, num_heads, d_ff, dropout, key,
                 compute_dtype=jnp.bfloat16):
        assert d_model % num_heads == 0
        self.d_model = d_model
        self.num_heads = num_heads
        self.d_k = d_model // num_heads
        self.d_ff = d_ff
        self.dropout = dropout          # eval mode: identity
        # bf16 MXU operands (f32 accumulation / f32 LN+softmax epilogues) by default.
        self.compute_dtype = compute_dtype
        self.ln_eps = 1e-5

        ks = jax.random.split(key, 12)
        bound_d = 1.0 / math.sqrt(d_model)
        bound_f = 1.0 / math.sqrt(d_ff)

        def lin(kw, kb, fan_in, fan_out, bound):
            w = jax.random.uniform(kw, (fan_in, fan_out), jnp.float32, -bound, bound)
            b = jax.random.uniform(kb, (fan_out,), jnp.float32, -bound, bound)
            return w, b

        wq, bq = lin(ks[0], ks[1], d_model, d_model, bound_d)
        wk, bk = lin(ks[2], ks[3], d_model, d_model, bound_d)
        wv, bv = lin(ks[4], ks[5], d_model, d_model, bound_d)
        # Fused QKV projection weight [D, 3D] / bias [3D]; 1/sqrt(d_k) folded into Q columns.
        w_qkv_raw = jnp.concatenate([wq, wk, wv], axis=1)
        b_qkv_raw = jnp.concatenate([bq, bk, bv], axis=0)
        scale = 1.0 / math.sqrt(self.d_k)
        col_scale = jnp.concatenate([jnp.full((d_model,), scale, jnp.float32),
                                     jnp.ones((2 * d_model,), jnp.float32)])
        self.w_qkv = w_qkv_raw * col_scale[None, :]
        self.b_qkv = b_qkv_raw * col_scale
        self._w_qkv_raw = w_qkv_raw     # kept only for the pure-JAX reference check
        self._b_qkv_raw = b_qkv_raw

        self.w_o, self.b_o = lin(ks[6], ks[7], d_model, d_model, bound_d)
        self.w_ff1, self.b_ff1 = lin(ks[8], ks[9], d_model, d_ff, bound_d)
        self.w_ff2, self.b_ff2 = lin(ks[10], ks[11], d_ff, d_model, bound_f)
        self.gamma1 = jnp.ones((d_model,), jnp.float32)
        self.beta1 = jnp.zeros((d_model,), jnp.float32)
        self.gamma2 = jnp.ones((d_model,), jnp.float32)
        self.beta2 = jnp.zeros((d_model,), jnp.float32)

    def __call__(self, x, mask=None):
        # TODO(synk): mask path (masked_fill -1e9) and train-mode dropout not wired.
        assert mask is None, "mask support not implemented"
        B, S, D = x.shape
        H, d_k = self.num_heads, self.d_k
        cd = self.compute_dtype
        act_dtype = cd                  # intermediate activation storage (halves HBM traffic in bf16)
        x2d = x.reshape(B * S, D)

        # 1) fused Q/K/V projection (one tiled matmul; scale already folded)
        qkv = fused_linear(x2d, self.w_qkv, self.b_qkv,
                           compute_dtype=cd, out_dtype=act_dtype)

        # head-major (B, H, S, d_k) so each head is a lane-dense BlockSpec tile
        qkv = qkv.reshape(B, S, 3, H, d_k)
        q = jnp.transpose(qkv[:, :, 0], (0, 2, 1, 3))
        k = jnp.transpose(qkv[:, :, 1], (0, 2, 1, 3))
        v = jnp.transpose(qkv[:, :, 2], (0, 2, 1, 3))

        # 2) flash-style multi-head attention over a (B, H, kv) grid
        attn = pallas_mha(q, k, v, compute_dtype=cd, out_dtype=act_dtype)
        attn2d = jnp.transpose(attn, (0, 2, 1, 3)).reshape(B * S, D)

        # 3) output projection + residual(x) + LayerNorm1 fused
        x1 = fused_linear(attn2d, self.w_o, self.b_o, residual=x2d,
                          ln_gamma=self.gamma1, ln_beta=self.beta1,
                          ln_eps=self.ln_eps, compute_dtype=cd, out_dtype=act_dtype)

        # 4) FFN linear1 + ReLU + linear2 + residual(x1) + LayerNorm2, single kernel
        out = fused_ffn(x1, self.w_ff1, self.b_ff1, self.w_ff2, self.b_ff2,
                        self.gamma2, self.beta2, ln_eps=self.ln_eps,
                        compute_dtype=cd, out_dtype=x.dtype)
        return out.reshape(B, S, D)


# ----------------------------------------------------------------------------
# Pure-JAX reference (for the correctness check in __main__)
# ----------------------------------------------------------------------------
def _reference_encoder_layer(layer, x):
    B, S, D = x.shape
    H, dk = layer.num_heads, layer.d_k
    x2d = x.reshape(B * S, D).astype(jnp.float32)
    qkv = x2d @ layer._w_qkv_raw + layer._b_qkv_raw
    q, k, v = jnp.split(qkv, 3, axis=-1)

    def heads(t):
        return t.reshape(B, S, H, dk).transpose(0, 2, 1, 3)

    qh, kh, vh = heads(q), heads(k), heads(v)
    scores = jnp.einsum('bhqd,bhkd->bhqk', qh, kh) / math.sqrt(dk)
    probs = jax.nn.softmax(scores, axis=-1)
    attn = jnp.einsum('bhqk,bhkd->bhqd', probs, vh)
    attn = attn.transpose(0, 2, 1, 3).reshape(B * S, D)
    attn_out = attn @ layer.w_o + layer.b_o

    def ln(y, g, b):
        mean = jnp.mean(y, axis=-1, keepdims=True)
        var = jnp.mean((y - mean) ** 2, axis=-1, keepdims=True)
        return (y - mean) / jnp.sqrt(var + layer.ln_eps) * g + b

    x1 = ln(x2d + attn_out, layer.gamma1, layer.beta1)
    hid = jnp.maximum(x1 @ layer.w_ff1 + layer.b_ff1, 0.0)
    ff = hid @ layer.w_ff2 + layer.b_ff2
    out = ln(x1 + ff, layer.gamma2, layer.beta2)
    return out.reshape(B, S, D)


if __name__ == "__main__":
    key = jax.random.PRNGKey(0)
    k_param, k_x = jax.random.split(key)

    B, S, d_model, num_heads, d_ff = 2, 8, 32, 4, 64

    layer = EncoderLayerPallas(d_model, num_heads, d_ff, dropout=0.1, key=k_param)
    x = jax.random.normal(k_x, (B, S, d_model), jnp.float32)

    ref = _reference_encoder_layer(layer, x)

    # Default path: bf16 MXU operands, f32 accumulation / epilogues.
    out_bf16 = layer(x, mask=None)
    jax.block_until_ready(out_bf16)
    assert out_bf16.shape == (B, S, d_model)
    assert out_bf16.dtype == jnp.float32
    err_bf16 = float(jnp.max(jnp.abs(out_bf16 - ref)))
    assert err_bf16 < 8e-2, f"bf16 path mismatch vs reference: max abs err {err_bf16}"

    # Exact-parity path: f32 operands everywhere.
    layer.compute_dtype = jnp.float32
    out_f32 = layer(x, mask=None)
    jax.block_until_ready(out_f32)
    err_f32 = float(jnp.max(jnp.abs(out_f32 - ref)))
    assert err_f32 < 2e-3, f"f32 path mismatch vs reference: max abs err {err_f32}"

    print("KERNEL_OK")
</pallas_src>

<mosaic_0001>
module attributes {stable_mosaic.version = 11 : i64} {
  func.func @_matmul_kernel(%arg0: i32, %arg1: i32, %arg2: i32, %arg3: memref<16x32xbf16, #tpu.memory_space<vmem>>, %arg4: memref<32x96xbf16, #tpu.memory_space<vmem>>, %arg5: memref<1x96xf32, #tpu.memory_space<vmem>>, %arg6: memref<16x96xbf16, #tpu.memory_space<vmem>>, %arg7: memref<16x96xf32, #tpu.memory_space<vmem>>) attributes {dimension_semantics = [#tpu.dimension_semantics<parallel>, #tpu.dimension_semantics<parallel>, #tpu.dimension_semantics<arbitrary>], iteration_bounds = array<i64: 1, 1, 1>, scalar_prefetch = 0 : i64, scratch_operands = 1 : i64, tpu.core_type = #tpu.core_type<tc>, window_params = [{transform_indices = @transform_0, window_bounds = array<i64: 16, 32>}, {transform_indices = @transform_1, window_bounds = array<i64: 32, 96>}, {transform_indices = @transform_2, window_bounds = array<i64: 1, 96>}, {transform_indices = @transform_3, window_bounds = array<i64: 16, 96>}]} {
    %c0_i32 = arith.constant 0 : i32
    %0 = arith.cmpi eq, %arg2, %c0_i32 : i32
    %1 = arith.extui %0 : i1 to i32
    %c0_i32_0 = arith.constant 0 : i32
    %2 = arith.cmpi ne, %1, %c0_i32_0 : i32
    scf.if %2 {
      %cst_10 = arith.constant 0.000000e+00 : f32
      %12 = vector.broadcast %cst_10 : f32 to vector<16x96xf32>
      %c0_11 = arith.constant 0 : index
      %c0_12 = arith.constant 0 : index
      %13 = vector.load %arg7[%c0_11, %c0_12] : memref<16x96xf32, #tpu.memory_space<vmem>>, vector<16x96xf32>
      tpu.vector_store %arg7[%c0_11, %c0_12], %12 {strides = array<i32>} : memref<16x96xf32, #tpu.memory_space<vmem>>, vector<16x96xf32>,
    } else {
    }
    %c0 = arith.constant 0 : index
    %c0_1 = arith.constant 0 : index
    %3 = vector.load %arg7[%c0, %c0_1] : memref<16x96xf32, #tpu.memory_space<vmem>>, vector<16x96xf32>
    %c0_2 = arith.constant 0 : index
    %c0_3 = arith.constant 0 : index
    %4 = vector.load %arg3[%c0_2, %c0_3] : memref<16x32xbf16, #tpu.memory_space<vmem>>, vector<16x32xbf16>
    %c0_4 = arith.constant 0 : index
    %c0_5 = arith.constant 0 : index
    %5 = vector.load %arg4[%c0_4, %c0_5] : memref<32x96xbf16, #tpu.memory_space<vmem>>, vector<32x96xbf16>
    %cst = arith.constant dense<0.000000e+00> : vector<16x96xf32>
    %6 = tpu.matmul %4, %5, %cst {dimension_numbers = #tpu.dot_dimension_numbers<[1], [0], [0], [1], [0, 0, 1, 1], [], []>} : vector<16x32xbf16>, vector<32x96xbf16>, vector<16x96xf32> -> vector<16x96xf32>
    %7 = arith.addf %3, %6 : vector<16x96xf32>
    %c0_6 = arith.constant 0 : index
    %c0_7 = arith.constant 0 : index
    %8 = vector.load %arg7[%c0_6, %c0_7] : memref<16x96xf32, #tpu.memory_space<vmem>>, vector<16x96xf32>
    tpu.vector_store %arg7[%c0_6, %c0_7], %7 {strides = array<i32>} : memref<16x96xf32, #tpu.memory_space<vmem>>, vector<16x96xf32>,
    %c0_i32_8 = arith.constant 0 : i32
    %9 = arith.cmpi eq, %arg2, %c0_i32_8 : i32
    %10 = arith.extui %9 : i1 to i32
    %c0_i32_9 = arith.constant 0 : i32
    %11 = arith.cmpi ne, %10, %c0_i32_9 : i32
    scf.if %11 {
      %c0_10 = arith.constant 0 : index
      %c0_11 = arith.constant 0 : index
      %12 = vector.load %arg7[%c0_10, %c0_11] : memref<16x96xf32, #tpu.memory_space<vmem>>, vector<16x96xf32>
      %c0_12 = arith.constant 0 : index
      %c0_13 = arith.constant 0 : index
      %13 = vector.load %arg5[%c0_12, %c0_13] : memref<1x96xf32, #tpu.memory_space<vmem>>, vector<1x96xf32>
      %14 = vector.broadcast %13 : vector<1x96xf32> to vector<16x96xf32>
      %15 = arith.addf %12, %14 : vector<16x96xf32>
      %16 = arith.truncf %15 : vector<16x96xf32> to vector<16x96xbf16>
      %c0_14 = arith.constant 0 : index
      %c0_15 = arith.constant 0 : index
      %17 = vector.load %arg6[%c0_14, %c0_15] : memref<16x96xbf16, #tpu.memory_space<vmem>>, vector<16x96xbf16>
      tpu.vector_store %arg6[%c0_14, %c0_15], %16 {strides = array<i32>} : memref<16x96xbf16, #tpu.memory_space<vmem>>, vector<16x96xbf16>,
    } else {
    }
    return
  }
  func.func @transform_0(%arg0: i32, %arg1: i32, %arg2: i32) -> (i32, i32) {
    %c0_i32 = arith.constant 0 : i32
    return %arg0, %arg2 : i32, i32
  }
  func.func @transform_1(%arg0: i32, %arg1: i32, %arg2: i32) -> (i32, i32) {
    %c0_i32 = arith.constant 0 : i32
    return %arg2, %arg1 : i32, i32
  }
  func.func @transform_2(%arg0: i32, %arg1: i32, %arg2: i32) -> (i32, i32) {
    %c0_i32 = arith.constant 0 : i32
    %c0_i32_0 = arith.constant 0 : i32
    return %c0_i32, %arg1 : i32, i32
  }
  func.func @transform_3(%arg0: i32, %arg1: i32, %arg2: i32) -> (i32, i32) {
    %c0_i32 = arith.constant 0 : i32
    return %arg0, %arg1 : i32, i32
  }
}

</mosaic_0001>

<bundles_post_ra>
// kernel: tpu_custom_call.1
= control target key start
LH: loop header
LB: loop body
LE: loop exit
PB: predicated region body
PF: predicated region fallthrough
CT: control target
= control target key end

     0   :  { %8 = vsyncpa [#allocation4], 0  ;;  %s350_s0 = inlined_call_operand.hbm [shape: bf16[16,32], index: 0, kind: input, shape index: {}]   ;;  %s351_s1 = inlined_call_operand.hbm [shape: bf16[32,96], index: 1, kind: input, shape index: {}]   ;;  %s352_s2 = inlined_call_operand.vmem [shape: f32[1,96], index: 2, kind: input, shape index: {}]   ;;  %s353_s3 = inlined_call_operand.hbm [shape: bf16[16,96], index: 3, kind: output, shape index: {}]  }
   0x1   :  { %9 = vsyncpa [#allocation7], 0 }
   0x2   :  { %10 = vsyncpa [#allocation5], 0  ;;  %s271_s12 = smov [#allocation3]   ;;  %s199_s16 = scalar_lea.hbm %s350_s0, 128 }
   0x3   :  { %s16_s13 = sshll.u32 %s271_s12, 4  ;;  %p200_p0 = scmp.ne.s32.totalorder %s350_s0, %s199_s16  ;;  %s17_s13 = int_to_ptr.vmem [resolvable:$true] %s16_s13 }
   0x4   :  { %p203_p1 = scmp.lt.u32.totalorder %s199_s16, %s350_s0 }
   0x6   :  { %p205_p2 = pnand %p203_p1, %p200_p0 }
   0x8   :  { %208 = shalt.err (!%p205_p2)
}
   0x9   :  { %s209_s21 = scalar_lea.vmem %s17_s13, 128  ;;  %p214_p4 = scmp.lt.s32.totalorder %s17_s13, %s17_s13 }
   0xa   :  { %p210_p3 = scmp.ne.s32.totalorder %s17_s13, %s209_s21  ;;  %p215_p5 = scmp.lt.s32.totalorder %s209_s21, %s209_s21 }
   0xc   :  { %p216_p6 = por %p215_p5, %p214_p4 }
   0xe   :  { %p217_p7 = pnand %p216_p6, %p210_p3 }
  0x10   :  { %220 = shalt.err (!%p217_p7)
}
  0x11   :  { %s272_s22 = smov 64   ;;  %s273_s23 = smov 4  }
  0x12   :  { %22 = dma.hbm_to_vmem [thread:$0]  %s350_s0, 128, %s17_s13, [#allocation4], %s272_s22, %s272_s22, %s273_s23  }
  0x13   :  { %s274_s26 = smov [#allocation6]   ;;  %s221_s30 = scalar_lea.hbm %s351_s1, 256 }
  0x14   :  { %s28_s27 = sshll.u32 %s274_s26, 4  ;;  %p222_p8 = scmp.ne.s32.totalorder %s351_s1, %s221_s30  ;;  %s29_s27 = int_to_ptr.vmem [resolvable:$true] %s28_s27 }
  0x15   :  { %p225_p9 = scmp.lt.u32.totalorder %s221_s30, %s351_s1 }
  0x17   :  { %p227_p10 = pnand %p225_p9, %p222_p8 }
  0x19   :  { %230 = shalt.err (!%p227_p10)
}
  0x1a   :  { %s231_s8 = scalar_lea.vmem %s29_s27, 256  ;;  %p236_p12 = scmp.lt.s32.totalorder %s29_s27, %s29_s27 }
  0x1b   :  { %p232_p11 = scmp.ne.s32.totalorder %s29_s27, %s231_s8  ;;  %p237_p13 = scmp.lt.s32.totalorder %s231_s8, %s231_s8 }
  0x1d   :  { %p238_p0 = por %p237_p13, %p236_p12 }
  0x1f   :  { %p239_p1 = pnand %p238_p0, %p232_p11 }
  0x21   :  { %242 = shalt.err (!%p239_p1)
}
  0x22   :  { %34 = dma.hbm_to_vmem [thread:$0]  %s351_s1, 256, %s29_s27, [#allocation7], %s272_s22, %s272_s22, %s273_s23  }
  0x23   :  { %265 = dma.done.wait [#allocation4], 128  }
  0x24   :  { %266 = vsyncadd [#allocation4], 4294967168 }
  0x25   :  { %267 = dma.done.wait [#allocation7], 256  }
  0x26   :  { %268 = vsyncadd [#allocation7], 4294967040  ;;  %vm48_vm0 = vcmask 785408   ;;  %v275_v0 = vmov 0.0   ;;  %vm276_vm1 = vmmov 0   ;;  %v196_v1 = vld [vmem:[#allocation6] sm:$0xff]  }
  0x27   :  { %49 = vst.msk [vmem:[#allocation2] sm:$0xff] %vm48_vm0, %v275_v0  ;;  %50 = vst.msk [vmem:[#allocation2 + $0x8] sm:$0xff] %vm48_vm0, %v275_v0  ;;  %181 = vmatprep.subr.bf16.mxu0 %v275_v0  ;;  %185 = vmatprep.mubr.msk.bf16.mxu0 %vm276_vm1, %v275_v0  ;;  %v197_v2 = vld [vmem:[#allocation6 + $0x8] sm:$0xff]   ;;  %v198_v3 = vld [vmem:[#allocation3] sm:$0xff]   ;;  %vm76_vm2 = vcmask 261120   ;;  %vm148_vm3 = vcmask 781312  }
  0x28   :  { %182 = vmatpush3.bf16.msra.mxu0 %v196_v1  ;;  %v173_v12 = vld [vmem:[%s352_s2] ss:$0 sm:$0xff]  ;;  %s277_s11 = smov [#allocation8]  }
  0x29   :  { %183 = vmatprep.subr.bf16.mxu0 %v275_v0  ;;  %s156_s12 = sshll.u32 %s277_s11, 4  ;;  %s157_s12 = int_to_ptr.vmem [resolvable:$true] %s156_s12 }
  0x2a   :  { %s243_s13 = scalar_lea.vmem %s157_s12, 128  ;;  %p248_p3 = scmp.lt.s32.totalorder %s157_s12, %s157_s12 }
  0x2b   :  { %p244_p2 = scmp.ne.s32.totalorder %s157_s12, %s243_s13  ;;  %p249_p4 = scmp.lt.s32.totalorder %s243_s13, %s243_s13 }
  0x2c   :  { %184 = vmatpush3.bf16.msra.mxu0 %v197_v2 }
  0x2d   :  { %p250_p5 = por %p249_p4, %p248_p3 }
  0x2e   :  { %v51_v4 = vld [vmem:[#allocation2] sm:$0xff]  ;;  %v52_v6 = vld [vmem:[#allocation2 + $0x8] sm:$0xff] }
  0x2f   :  { %186 = vmatmul.mubr.msk.bf16.vlgmr.msra.gmra.mrb[0].mxu0 %vm76_vm2, %v198_v3  ;;  %p251_p6 = pnand %p250_p5, %p244_p2 }
 0x102   :  { %v114_v5 = vpop.f32.mrb[0].mxu0 }
 0x103   :  { %v121_v7 = vadd.f32 %v114_v5, %v51_v4  ;;  %v187_v8 = vpop.f32.mrb[1].mxu0 }
 0x104   :  { %v117_v9 = vpop.f32.mrb[2].mxu0 }
 0x105   :  { %124 = vst.msk [vmem:[#allocation2] sm:$0xff] %vm48_vm0, %v121_v7  ;;  %v122_v10 = vadd.f32 %v117_v9, %v52_v6  ;;  %v188_v11 = vpop.f32.mrb[3].mxu0 }
 0x107   :  { %125 = vst.msk [vmem:[#allocation2 + $0x8] sm:$0xff] %vm48_vm0, %v122_v10 }
 0x10c   :  { %v129_v13 = vld [vmem:[#allocation2] sm:$0xff] }
 0x10d   :  { %v138_v14 = vadd.f32 %v173_v12, %v129_v13 }
 0x10e   :  { %v130_v15 = vld [vmem:[#allocation2 + $0x8] sm:$0xff] }
 0x10f   :  { %v139_v16 = vadd.f32 %v173_v12, %v130_v15  ;;  %v176_v17 = vpack.c.bf16 %v138_v14, %v138_v14 }
 0x111   :  { %v177_v18 = vpack.c.bf16 %v139_v16, %v139_v16  ;;  %149 = vst.msk [vmem:[#allocation8] sm:$0xf] %vm148_vm3, %v176_v17 }
 0x113   :  { %150 = vst.msk [vmem:[#allocation8 + $0x4] sm:$0xf] %vm148_vm3, %v177_v18 }
 0x114   :  { %254 = shalt.err (!%p251_p6)
}
 0x115   :  { %s255_s15 = scalar_lea.hbm %s353_s3, 128 }
 0x116   :  { %p256_p7 = scmp.ne.s32.totalorder %s353_s3, %s255_s15  ;;  %p259_p8 = scmp.lt.u32.totalorder %s255_s15, %s353_s3 }
 0x118   :  { %p261_p9 = pnand %p259_p8, %p256_p7 }
 0x11a   :  { %264 = shalt.err (!%p261_p9)
}
 0x11b   :  { %162 = dma.vmem_to_hbm [thread:$0]  %s157_s12, 128, %s353_s3, [#allocation5], %s272_s22, %s272_s22, %s273_s23  }
 0x11c   :  { %269 = dma.done.wait [#allocation5], 128  }
 0x11d   :  { %270 = vsyncadd [#allocation5], 4294967168 }
 0x11e   :  { %166 = vsyncpa [#allocation4], 1 }
 0x11f   :  { %167 = vsyncpa [#allocation7], 1 }
 0x120   :  { %168 = vsyncpa [#allocation5], 1 }

</bundles_post_ra>
